<compile_context>
chip_gen: v5e
topology: v5e:2x2
jax: 0.10.0
libtpu: 0.0.40
codegen_flags: <defaults>
</compile_context>

<pallas_src>
import jax
import jax.numpy as jnp
from jax.experimental import pallas as pl
from jax.experimental.pallas import tpu as pltpu


def _latent_query_kernel(x_hbm_ref, q_ref, o_ref):
    # Forward ignores x (same as the PyTorch module). x stays in HBM (pl.ANY)
    # and is never touched, so no DMA is issued for it.
    del x_hbm_ref
    # The only "compute" is returning the parameter: a tiny VMEM->VMEM copy
    # of the lane-dense query slab into the output slab.
    o_ref[...] = q_ref[...]


def latent_query_forward(x, query):
    """Pallas equivalent of LatentQuery.forward.

    Args:
      x: ignored input (NCHW float32 array); accepted for signature parity,
         never read and never DMA'd.
      query: float32 parameter of shape (nh,).
    Returns:
      float32 array of shape (nh,) == query (exact copy).
    """
    nh = query.shape[0]
    nh_pad = 128 * pl.cdiv(nh, 128)  # lane-dense, 128-aligned output width

    # (1, nh_pad) f32 slab: last dim maps onto vreg lanes, zero padded.
    q2d = jnp.zeros((1, nh_pad), dtype=jnp.float32).at[0, :nh].set(
        query.astype(jnp.float32)
    )

    out = pl.pallas_call(
        _latent_query_kernel,
        out_shape=jax.ShapeDtypeStruct((1, nh_pad), jnp.float32),
        in_specs=[
            # x: leave in HBM, no block / no DMA.
            pl.BlockSpec(memory_space=pl.ANY),
            # query slab: full block in VMEM.
            pl.BlockSpec((1, nh_pad), lambda: (0, 0)),
        ],
        out_specs=pl.BlockSpec((1, nh_pad), lambda: (0, 0)),
        cost_estimate=pl.CostEstimate(
            flops=0,
            transcendentals=0,
            bytes_accessed=2 * nh_pad * 4,  # read q slab + write output slab
        ),
    )(x, q2d)

    return out[0, :nh]


if __name__ == "__main__":
    key = jax.random.PRNGKey(0)

    # Small shapes consistent with the module: x is arbitrary (ignored),
    # nh is the hidden size of the latent query.
    B, C, H, W = 2, 4, 16, 16
    nh = 32

    x = jax.random.normal(key, (B, C, H, W), dtype=jnp.float32)

    # Deterministic parameter init matching nn.Parameter(torch.ones(nh)).
    query = jnp.ones((nh,), dtype=jnp.float32)

    out = latent_query_forward(x, query)
    out = jax.block_until_ready(out)

    # Reference check: forward must return exactly the parameter.
    assert out.shape == (nh,)
    assert out.dtype == jnp.float32
    assert bool(jnp.all(out == query))

    print("KERNEL_OK")
</pallas_src>

<mosaic_0001>
module attributes {stable_mosaic.version = 11 : i64} {
  func.func @_latent_query_kernel(%arg0: memref<2x4x16x16xf32, #tpu.memory_space<any>>, %arg1: memref<1x128xf32, #tpu.memory_space<vmem>>, %arg2: memref<1x128xf32, #tpu.memory_space<vmem>>) attributes {dimension_semantics = [], scalar_prefetch = 0 : i64, scratch_operands = 0 : i64, tpu.core_type = #tpu.core_type<tc>} {
    %c0 = arith.constant 0 : index
    %c0_0 = arith.constant 0 : index
    %0 = vector.load %arg1[%c0, %c0_0] : memref<1x128xf32, #tpu.memory_space<vmem>>, vector<1x128xf32>
    %c0_1 = arith.constant 0 : index
    %c0_2 = arith.constant 0 : index
    %1 = vector.load %arg2[%c0_1, %c0_2] : memref<1x128xf32, #tpu.memory_space<vmem>>, vector<1x128xf32>
    tpu.vector_store %arg2[%c0_1, %c0_2], %0 {strides = array<i32>} : memref<1x128xf32, #tpu.memory_space<vmem>>, vector<1x128xf32>,
    return
  }
}

</mosaic_0001>

<bundles_post_ra>
// kernel: tpu_custom_call.1
= control target key start
LH: loop header
LB: loop body
LE: loop exit
PB: predicated region body
PF: predicated region fallthrough
CT: control target
= control target key end

     0   :  { %7 = vsyncpa [#allocation3], 0  ;;  %s120_s0 = inlined_call_operand.hbm [shape: f32[2,4,16,16], index: 0, kind: input, shape index: {}]   ;;  %s121_s1 = inlined_call_operand.hbm [shape: f32[1,128], index: 1, kind: input, shape index: {}]   ;;  %s122_s2 = inlined_call_operand.hbm [shape: f32[1,128], index: 2, kind: output, shape index: {}]  }
   0x1   :  { %8 = vsyncpa [#allocation4], 0  ;;  %s14_s11 = sshll.u32 %s121_s1, 4  ;;  %s97_s12 = smov [#allocation2]   ;;  %s15_s11 = int_to_ptr.hbm [resolvable:$true] %s14_s11 }
   0x2   :  { %s16_s13 = sshll.u32 %s97_s12, 4  ;;  %s17_s13 = int_to_ptr.vmem [resolvable:$true] %s16_s13 }
   0x3   :  { %19 = dma.hbm_to_vmem [thread:$0]  %s15_s11, 16, %s17_s13, [#allocation3]  }
   0x4   :  { %93 = dma.done.wait [#allocation3], 16  }
   0x5   :  { %94 = vsyncadd [#allocation3], 4294967280  ;;  %s98_s0 = smov [#allocation5]   ;;  %s33_s17 = sshll.u32 %s122_s2, 4  ;;  %v24_v0 = vld [vmem:[#allocation2] sm:$0x1]  ;;  %s34_s17 = int_to_ptr.hbm [resolvable:$true] %s33_s17 }
   0x6   :  { %s31_s14 = sshll.u32 %s98_s0, 4  ;;  %25 = vst [vmem:[#allocation5] sm:$0x1] %v24_v0  ;;  %s32_s14 = int_to_ptr.vmem [resolvable:$true] %s31_s14 }
   0x7   :  { %36 = dma.vmem_to_hbm [thread:$0]  %s32_s14, 16, %s34_s17, [#allocation4]  }
   0x8   :  { %95 = dma.done.wait [#allocation4], 16  }
   0x9   :  { %96 = vsyncadd [#allocation4], 4294967280 }
   0xa   :  { %41 = vsyncpa [#allocation3], 1 }
   0xb   :  { %42 = vsyncpa [#allocation4], 1 }

</bundles_post_ra>
